<compile_context>
chip_gen: v6e
topology: v6e:2x2x1
jax: 0.10.0
libtpu: 0.0.40
codegen_flags: <defaults>
</compile_context>

<pallas_src>
import math

import jax
import jax.numpy as jnp
from jax import lax
from jax.experimental import pallas as pl
from jax.experimental.pallas import tpu as pltpu


def _round_up(x, m):
    return ((x + m - 1) // m) * m


# ----------------------- reparameterization (elementwise) -----------------------
def _reparam_kernel(mean_ref, rho_ref, eps_ref, out_ref):
    # embeddings = mean + softplus(rho) * eps  on a (tv, te) tile
    std = jnp.log1p(jnp.exp(rho_ref[...]))
    out_ref[...] = mean_ref[...] + std * eps_ref[...]


def _reparameterize(mean_p, rho_p, eps_p, tv, te):
    Vp, Ep = mean_p.shape
    spec = pl.BlockSpec((tv, te), lambda i, j: (i, j))
    return pl.pallas_call(
        _reparam_kernel,
        out_shape=jax.ShapeDtypeStruct((Vp, Ep), jnp.float32),
        grid_spec=pltpu.PrefetchScalarGridSpec(
            num_scalar_prefetch=0,
            grid=(Vp // tv, Ep // te),
            in_specs=[spec, spec, spec],
            out_specs=spec,
        ),
        compiler_params=pltpu.CompilerParams(
            dimension_semantics=("parallel", "parallel")),
    )(mean_p, rho_p, eps_p)


# --------------------------------- matmul: A @ B.T ---------------------------------
def _matmul_kernel(a_ref, b_ref, o_ref, acc_ref):
    # out[i, j] = sum_k a[i, k] * b[j, k]  (data @ embeddings.T), accumulated
    # over the K grid axis into an f32 VMEM scratch.
    @pl.when(pl.program_id(2) == 0)
    def _():
        acc_ref[...] = jnp.zeros_like(acc_ref)

    acc_ref[...] += lax.dot_general(
        a_ref[...], b_ref[...],
        dimension_numbers=(((1,), (1,)), ((), ())),   # contract last dims (trans_b)
        preferred_element_type=jnp.float32)

    @pl.when(pl.program_id(2) == pl.num_programs(2) - 1)
    def _():
        o_ref[...] = acc_ref[...].astype(o_ref.dtype)


def _matmul_abt(a_p, b_p, tm, tn, tk):
    Mp, Ep = a_p.shape
    Vp, _ = b_p.shape
    return pl.pallas_call(
        _matmul_kernel,
        out_shape=jax.ShapeDtypeStruct((Mp, Vp), jnp.float32),
        grid_spec=pltpu.PrefetchScalarGridSpec(
            num_scalar_prefetch=0,
            grid=(Mp // tm, Vp // tn, Ep // tk),
            in_specs=[
                pl.BlockSpec((tm, tk), lambda i, j, k: (i, k)),
                pl.BlockSpec((tn, tk), lambda i, j, k: (j, k)),
            ],
            out_specs=pl.BlockSpec((tm, tn), lambda i, j, k: (i, j)),
            scratch_shapes=[pltpu.VMEM((tm, tn), jnp.float32)],
        ),
        compiler_params=pltpu.CompilerParams(
            dimension_semantics=("parallel", "parallel", "arbitrary")),
    )(a_p, b_p)


# ------------------------------------- wrapper -------------------------------------
def variational_linear(data, mean, rho, *, training=False, key=None):
    """Forward pass of VariationalLinear: data @ embeddings.T."""
    assert data.ndim > 1, "data should be at least 2 dimensional"
    V, E = mean.shape
    assert data.shape[-1] == E

    lead = data.shape[:-1]
    M = math.prod(lead)
    data2d = data.reshape(M, E).astype(jnp.float32)
    mean = mean.astype(jnp.float32)

    # Lane-dense tiles (multiples of 128), capped at 512 rows -> <=1 MiB/block,
    # comfortably inside the scoped-VMEM default on v5e/v6e/v7x.
    tm = min(512, _round_up(M, 128))
    tn = min(512, _round_up(V, 128))
    tk = min(512, _round_up(E, 128))
    Mp, Vp, Ep = _round_up(M, tm), _round_up(V, tn), _round_up(E, tk)

    data_p = jnp.pad(data2d, ((0, Mp - M), (0, Ep - E)))
    mean_p = jnp.pad(mean, ((0, Vp - V), (0, Ep - E)))

    if training:
        assert key is not None, "training mode needs a PRNG key for eps"
        # eps ~ N(0,1) (reparameterization trick); zero padding keeps the
        # padded rows/cols of the embedding table exactly zero.
        eps = jax.random.normal(key, (V, E), jnp.float32)
        rho_p = jnp.pad(rho.astype(jnp.float32), ((0, Vp - V), (0, Ep - E)))
        eps_p = jnp.pad(eps, ((0, Vp - V), (0, Ep - E)))
        emb_p = _reparameterize(mean_p, rho_p, eps_p, tn, tk)
    else:
        emb_p = mean_p

    out_p = _matmul_abt(data_p, emb_p, tm, tn, tk)
    return out_p[:M, :V].reshape(*lead, V)


if __name__ == "__main__":
    key = jax.random.PRNGKey(0)
    k1, k2, k3, k4 = jax.random.split(key, 4)

    B, S, E, V = 2, 8, 32, 64   # small demo shapes: (batch, seq, hidden) x (vocab, hidden)
    data = jax.random.normal(k1, (B, S, E), jnp.float32)
    mean = 0.1 * jax.random.normal(k2, (V, E), jnp.float32)
    rho = 0.1 * jax.random.normal(k3, (V, E), jnp.float32) - 3.0

    # --- eval mode: embeddings = mean (deterministic path) ---
    out_eval = jax.block_until_ready(
        variational_linear(data, mean, rho, training=False))
    ref_eval = jnp.einsum("bse,ve->bsv", data, mean)
    assert out_eval.shape == (B, S, V)
    assert out_eval.dtype == jnp.float32
    assert jnp.allclose(out_eval, ref_eval, atol=1e-3, rtol=1e-3)

    # --- training mode: embeddings = mean + softplus(rho) * eps ---
    out_train = jax.block_until_ready(
        variational_linear(data, mean, rho, training=True, key=k4))
    eps = jax.random.normal(k4, (V, E), jnp.float32)
    emb = mean + jnp.log1p(jnp.exp(rho)) * eps
    ref_train = jnp.einsum("bse,ve->bsv", data, emb)
    assert out_train.shape == (B, S, V)
    assert jnp.allclose(out_train, ref_train, atol=1e-3, rtol=1e-3)

    print("KERNEL_OK")
</pallas_src>

<mosaic_0001>
module attributes {stable_mosaic.version = 11 : i64} {
  func.func @_matmul_kernel(%arg0: i32, %arg1: i32, %arg2: i32, %arg3: memref<128x128xf32, #tpu.memory_space<vmem>>, %arg4: memref<128x128xf32, #tpu.memory_space<vmem>>, %arg5: memref<128x128xf32, #tpu.memory_space<vmem>>, %arg6: memref<128x128xf32, #tpu.memory_space<vmem>>) attributes {dimension_semantics = [#tpu.dimension_semantics<parallel>, #tpu.dimension_semantics<parallel>, #tpu.dimension_semantics<arbitrary>], iteration_bounds = array<i64: 1, 1, 1>, scalar_prefetch = 0 : i64, scratch_operands = 1 : i64, tpu.core_type = #tpu.core_type<tc>, window_params = [{transform_indices = @transform_0, window_bounds = array<i64: 128, 128>}, {transform_indices = @transform_1, window_bounds = array<i64: 128, 128>}, {transform_indices = @transform_2, window_bounds = array<i64: 128, 128>}]} {
    %c0_i32 = arith.constant 0 : i32
    %0 = arith.cmpi eq, %arg2, %c0_i32 : i32
    %1 = arith.extui %0 : i1 to i32
    %c0_i32_0 = arith.constant 0 : i32
    %2 = arith.cmpi ne, %1, %c0_i32_0 : i32
    scf.if %2 {
      %cst_10 = arith.constant 0.000000e+00 : f32
      %12 = vector.broadcast %cst_10 : f32 to vector<128x128xf32>
      %c0_11 = arith.constant 0 : index
      %c0_12 = arith.constant 0 : index
      %13 = vector.load %arg6[%c0_11, %c0_12] : memref<128x128xf32, #tpu.memory_space<vmem>>, vector<128x128xf32>
      tpu.vector_store %arg6[%c0_11, %c0_12], %12 {strides = array<i32>} : memref<128x128xf32, #tpu.memory_space<vmem>>, vector<128x128xf32>,
    } else {
    }
    %c0 = arith.constant 0 : index
    %c0_1 = arith.constant 0 : index
    %3 = vector.load %arg6[%c0, %c0_1] : memref<128x128xf32, #tpu.memory_space<vmem>>, vector<128x128xf32>
    %c0_2 = arith.constant 0 : index
    %c0_3 = arith.constant 0 : index
    %4 = vector.load %arg3[%c0_2, %c0_3] : memref<128x128xf32, #tpu.memory_space<vmem>>, vector<128x128xf32>
    %c0_4 = arith.constant 0 : index
    %c0_5 = arith.constant 0 : index
    %5 = vector.load %arg4[%c0_4, %c0_5] : memref<128x128xf32, #tpu.memory_space<vmem>>, vector<128x128xf32>
    %cst = arith.constant dense<0.000000e+00> : vector<128x128xf32>
    %6 = tpu.matmul %4, %5, %cst {dimension_numbers = #tpu.dot_dimension_numbers<[1], [1], [0], [0], [0, 0, 1, 0], [], []>} : vector<128x128xf32>, vector<128x128xf32>, vector<128x128xf32> -> vector<128x128xf32>
    %7 = arith.addf %3, %6 : vector<128x128xf32>
    %c0_6 = arith.constant 0 : index
    %c0_7 = arith.constant 0 : index
    %8 = vector.load %arg6[%c0_6, %c0_7] : memref<128x128xf32, #tpu.memory_space<vmem>>, vector<128x128xf32>
    tpu.vector_store %arg6[%c0_6, %c0_7], %7 {strides = array<i32>} : memref<128x128xf32, #tpu.memory_space<vmem>>, vector<128x128xf32>,
    %c0_i32_8 = arith.constant 0 : i32
    %9 = arith.cmpi eq, %arg2, %c0_i32_8 : i32
    %10 = arith.extui %9 : i1 to i32
    %c0_i32_9 = arith.constant 0 : i32
    %11 = arith.cmpi ne, %10, %c0_i32_9 : i32
    scf.if %11 {
      %c0_10 = arith.constant 0 : index
      %c0_11 = arith.constant 0 : index
      %12 = vector.load %arg6[%c0_10, %c0_11] : memref<128x128xf32, #tpu.memory_space<vmem>>, vector<128x128xf32>
      %c0_12 = arith.constant 0 : index
      %c0_13 = arith.constant 0 : index
      %13 = vector.load %arg5[%c0_12, %c0_13] : memref<128x128xf32, #tpu.memory_space<vmem>>, vector<128x128xf32>
      tpu.vector_store %arg5[%c0_12, %c0_13], %12 {strides = array<i32>} : memref<128x128xf32, #tpu.memory_space<vmem>>, vector<128x128xf32>,
    } else {
    }
    return
  }
  func.func @transform_0(%arg0: i32, %arg1: i32, %arg2: i32) -> (i32, i32) {
    %c0_i32 = arith.constant 0 : i32
    return %arg0, %arg2 : i32, i32
  }
  func.func @transform_1(%arg0: i32, %arg1: i32, %arg2: i32) -> (i32, i32) {
    %c0_i32 = arith.constant 0 : i32
    return %arg1, %arg2 : i32, i32
  }
  func.func @transform_2(%arg0: i32, %arg1: i32, %arg2: i32) -> (i32, i32) {
    %c0_i32 = arith.constant 0 : i32
    return %arg0, %arg1 : i32, i32
  }
}

</mosaic_0001>

<bundles_post_ra>
// kernel: tpu_custom_call.1
= control target key start
LH: loop header
LB: loop body
LE: loop exit
PB: predicated region body
PF: predicated region fallthrough
CT: control target
= control target key end

     0   :  { %7 = vsyncpa [#allocation4], 0  ;;  %s567_s0 = inlined_call_operand.hbm [shape: f32[128,128], index: 0, kind: input, shape index: {}]   ;;  %s568_s1 = inlined_call_operand.hbm [shape: f32[128,128], index: 1, kind: input, shape index: {}]   ;;  %s569_s2 = inlined_call_operand.hbm [shape: f32[128,128], index: 2, kind: output, shape index: {}]  }
   0x1   :  { %8 = vsyncpa [#allocation7], 0 }
   0x2   :  { %9 = vsyncpa [#allocation5], 0  ;;  %s529_s9 = smov [#allocation3]  }
   0x3   :  { %s15_s10 = sshll.u32 %s529_s9, 4  ;;  %s16_s10 = int_to_ptr.vmem [resolvable:$true] %s15_s10 }
   0x4   :  { %s471_s11 = scalar_lea.vmem %s16_s10, 2048  ;;  %p476_p1 = scmp.lt.s32.totalorder %s16_s10, %s16_s10 }
   0x5   :  { %p472_p0 = scmp.ne.s32.totalorder %s16_s10, %s471_s11  ;;  %p477_p2 = scmp.lt.s32.totalorder %s471_s11, %s471_s11 }
   0x7   :  { %p478_p3 = por %p477_p2, %p476_p1 }
   0x9   :  { %p479_p4 = pnand %p478_p3, %p472_p0 }
   0xb   :  { %482 = shalt.err (!%p479_p4)
}
   0xc   :  { %s530_s12 = smov 128   ;;  %s531_s13 = smov 8  }
   0xd   :  { %21 = dma.hbm_to_vmem [thread:$0]  %s567_s0, 2048, %s16_s10, [#allocation4], %s530_s12, %s530_s12, %s531_s13  }
   0xe   :  { %s532_s16 = smov [#allocation6]  }
   0xf   :  { %s27_s17 = sshll.u32 %s532_s16, 4  ;;  %s28_s17 = int_to_ptr.vmem [resolvable:$true] %s27_s17 }
  0x10   :  { %s491_s18 = scalar_lea.vmem %s28_s17, 2048  ;;  %p496_p6 = scmp.lt.s32.totalorder %s28_s17, %s28_s17 }
  0x11   :  { %p492_p5 = scmp.ne.s32.totalorder %s28_s17, %s491_s18  ;;  %p497_p7 = scmp.lt.s32.totalorder %s491_s18, %s491_s18 }
  0x13   :  { %p498_p8 = por %p497_p7, %p496_p6 }
  0x15   :  { %p499_p9 = pnand %p498_p8, %p492_p5 }
  0x17   :  { %502 = shalt.err (!%p499_p9)
}
  0x18   :  { %33 = dma.hbm_to_vmem [thread:$0]  %s568_s1, 2048, %s28_s17, [#allocation7], %s530_s12, %s530_s12, %s531_s13  }
  0x19   :  { %523 = dma.done.wait [#allocation4], 2048  }
  0x1a   :  { %524 = vsyncadd [#allocation4], 4294965248 }
  0x1b   :  { %525 = dma.done.wait [#allocation7], 2048  }
  0x1c   :  { %526 = vsyncadd [#allocation7], 4294965248  ;;  %v107_v0 = vld [vmem:[#allocation6 + $0x78] sm:$0xff]  ;;  %v106_v1 = vld [vmem:[#allocation6 + $0x70] sm:$0xff]  ;;  %s533_s0 = smov [#allocation8]  }
  0x1d   :  { %370 = vmatprep.subr.mxu0 %v107_v0  ;;  %426 = vmatprep.subr.mxu1 %v107_v0  ;;  %v105_v2 = vld [vmem:[#allocation6 + $0x68] sm:$0xff]  ;;  %v76_v3 = vld [vmem:[#allocation3] sm:$0xff]  ;;  %v103_v6 = vld [vmem:[#allocation6 + $0x58] sm:$0xff]  ;;  %s325_s1 = sshll.u32 %s533_s0, 4  ;;  %s326_s1 = int_to_ptr.vmem [resolvable:$true] %s325_s1 }
  0x1e   :  { %371 = vmatpush3.xpose.msra.mxu0 %v107_v0  ;;  %442 = vmatpush3.xpose.msra.mxu1 %v107_v0  ;;  %v84_v4 = vld [vmem:[#allocation3 + $0x40] sm:$0xff]  ;;  %v102_v7 = vld [vmem:[#allocation6 + $0x50] sm:$0xff]  ;;  %v101_v8 = vld [vmem:[#allocation6 + $0x48] sm:$0xff]  ;;  %s503_s21 = scalar_lea.vmem %s326_s1, 2048  ;;  %p508_p11 = scmp.lt.s32.totalorder %s326_s1, %s326_s1 }
  0x1f   :  { %372 = vmatprep.subr.mxu0 %v106_v1  ;;  %427 = vmatprep.subr.mxu1 %v106_v1  ;;  %v104_v5 = vld [vmem:[#allocation6 + $0x60] sm:$0xff]  ;;  %v99_v10 = vld [vmem:[#allocation6 + $0x38] sm:$0xff]  ;;  %v98_v11 = vld [vmem:[#allocation6 + $0x30] sm:$0xff]  ;;  %p504_p10 = scmp.ne.s32.totalorder %s326_s1, %s503_s21  ;;  %p509_p12 = scmp.lt.s32.totalorder %s503_s21, %s503_s21 }
  0x20   :  { %402 = vmatprep.mubr.f32.mxu0 %v76_v3  ;;  %414 = vmatprep.mubr.f32.mxu1 %v84_v4  ;;  %v100_v9 = vld [vmem:[#allocation6 + $0x40] sm:$0xff]  ;;  %v97_v12 = vld [vmem:[#allocation6 + $0x28] sm:$0xff]  ;;  %v95_v14 = vld [vmem:[#allocation6 + $0x18] sm:$0xff] }
  0x21   :  { %v96_v13 = vld [vmem:[#allocation6 + $0x20] sm:$0xff]  ;;  %v94_v15 = vld [vmem:[#allocation6 + $0x10] sm:$0xff]  ;;  %v93_v16 = vld [vmem:[#allocation6 + $0x8] sm:$0xff]  ;;  %p510_p13 = por %p509_p12, %p508_p11 }
  0x22   :  { %373 = vmatpush3.xpose.msra.mxu0 %v106_v1  ;;  %443 = vmatpush3.xpose.msra.mxu1 %v106_v1  ;;  %v92_v17 = vld [vmem:[#allocation6] sm:$0xff]  ;;  %v77_v18 = vld [vmem:[#allocation3 + $0x8] sm:$0xff]  ;;  %v78_v20 = vld [vmem:[#allocation3 + $0x10] sm:$0xff] }
  0x23   :  { %374 = vmatprep.subr.mxu0 %v105_v2  ;;  %428 = vmatprep.subr.mxu1 %v105_v2  ;;  %v85_v19 = vld [vmem:[#allocation3 + $0x48] sm:$0xff]  ;;  %v86_v21 = vld [vmem:[#allocation3 + $0x50] sm:$0xff]  ;;  %v79_v22 = vld [vmem:[#allocation3 + $0x18] sm:$0xff]  ;;  %p511_p0 = pnand %p510_p13, %p504_p10 }
  0x24   :  { %v87_v23 = vld [vmem:[#allocation3 + $0x58] sm:$0xff]  ;;  %v80_v24 = vld [vmem:[#allocation3 + $0x20] sm:$0xff]  ;;  %v81_v26 = vld [vmem:[#allocation3 + $0x28] sm:$0xff] }
  0x25   :  { %v88_v25 = vld [vmem:[#allocation3 + $0x60] sm:$0xff]  ;;  %v89_v27 = vld [vmem:[#allocation3 + $0x68] sm:$0xff]  ;;  %v82_v28 = vld [vmem:[#allocation3 + $0x30] sm:$0xff] }
  0x26   :  { %375 = vmatpush3.xpose.msra.mxu0 %v105_v2  ;;  %444 = vmatpush3.xpose.msra.mxu1 %v105_v2  ;;  %v90_v29 = vld [vmem:[#allocation3 + $0x70] sm:$0xff]  ;;  %v83_v30 = vld [vmem:[#allocation3 + $0x38] sm:$0xff] }
  0x27   :  { %376 = vmatprep.subr.mxu0 %v104_v5  ;;  %429 = vmatprep.subr.mxu1 %v104_v5  ;;  %v91_v31 = vld [vmem:[#allocation3 + $0x78] sm:$0xff] }
  0x2a   :  { %377 = vmatpush3.xpose.msra.mxu0 %v104_v5  ;;  %445 = vmatpush3.xpose.msra.mxu1 %v104_v5 }
  0x2b   :  { %378 = vmatprep.subr.mxu0 %v103_v6  ;;  %430 = vmatprep.subr.mxu1 %v103_v6 }
  0x2e   :  { %379 = vmatpush3.xpose.msra.mxu0 %v103_v6  ;;  %446 = vmatpush3.xpose.msra.mxu1 %v103_v6 }
  0x2f   :  { %380 = vmatprep.subr.mxu0 %v102_v7  ;;  %431 = vmatprep.subr.mxu1 %v102_v7 }
  0x32   :  { %381 = vmatpush3.xpose.msra.mxu0 %v102_v7  ;;  %447 = vmatpush3.xpose.msra.mxu1 %v102_v7 }
  0x33   :  { %382 = vmatprep.subr.mxu0 %v101_v8  ;;  %432 = vmatprep.subr.mxu1 %v101_v8 }
  0x36   :  { %383 = vmatpush3.xpose.msra.mxu0 %v101_v8  ;;  %448 = vmatpush3.xpose.msra.mxu1 %v101_v8 }
  0x37   :  { %384 = vmatprep.subr.mxu0 %v100_v9  ;;  %433 = vmatprep.subr.mxu1 %v100_v9 }
  0x3a   :  { %385 = vmatpush3.xpose.msra.mxu0 %v100_v9  ;;  %449 = vmatpush3.xpose.msra.mxu1 %v100_v9 }
  0x3b   :  { %386 = vmatprep.subr.mxu0 %v99_v10  ;;  %434 = vmatprep.subr.mxu1 %v99_v10 }
  0x3e   :  { %387 = vmatpush3.xpose.msra.mxu0 %v99_v10  ;;  %450 = vmatpush3.xpose.msra.mxu1 %v99_v10 }
  0x3f   :  { %388 = vmatprep.subr.mxu0 %v98_v11  ;;  %435 = vmatprep.subr.mxu1 %v98_v11 }
  0x42   :  { %389 = vmatpush3.xpose.msra.mxu0 %v98_v11  ;;  %451 = vmatpush3.xpose.msra.mxu1 %v98_v11 }
  0x43   :  { %390 = vmatprep.subr.mxu0 %v97_v12  ;;  %436 = vmatprep.subr.mxu1 %v97_v12 }
  0x46   :  { %391 = vmatpush3.xpose.msra.mxu0 %v97_v12  ;;  %452 = vmatpush3.xpose.msra.mxu1 %v97_v12 }
  0x47   :  { %392 = vmatprep.subr.mxu0 %v96_v13  ;;  %437 = vmatprep.subr.mxu1 %v96_v13 }
  0x4a   :  { %393 = vmatpush3.xpose.msra.mxu0 %v96_v13  ;;  %453 = vmatpush3.xpose.msra.mxu1 %v96_v13 }
  0x4b   :  { %394 = vmatprep.subr.mxu0 %v95_v14  ;;  %438 = vmatprep.subr.mxu1 %v95_v14 }
  0x4e   :  { %395 = vmatpush3.xpose.msra.mxu0 %v95_v14  ;;  %454 = vmatpush3.xpose.msra.mxu1 %v95_v14 }
  0x4f   :  { %396 = vmatprep.subr.mxu0 %v94_v15  ;;  %439 = vmatprep.subr.mxu1 %v94_v15 }
  0x52   :  { %397 = vmatpush3.xpose.msra.mxu0 %v94_v15  ;;  %455 = vmatpush3.xpose.msra.mxu1 %v94_v15 }
  0x53   :  { %398 = vmatprep.subr.mxu0 %v93_v16  ;;  %440 = vmatprep.subr.mxu1 %v93_v16 }
  0x56   :  { %399 = vmatpush3.xpose.msra.mxu0 %v93_v16  ;;  %456 = vmatpush3.xpose.msra.mxu1 %v93_v16 }
  0x57   :  { %400 = vmatprep.subr.mxu0 %v92_v17  ;;  %441 = vmatprep.subr.mxu1 %v92_v17 }
  0x5a   :  { %401 = vmatpush3.xpose.msra.mxu0 %v92_v17  ;;  %457 = vmatpush3.xpose.msra.mxu1 %v92_v17 }
  0x5d   :  { %403 = vmatmul.mubr.f32.vlgmr.msra.gmra.mxu0 %v77_v18  ;;  %415 = vmatmul.mubr.f32.vlgmr.msra.gmra.mxu1 %v85_v19 }
  0x5e   :  { %405 = vmatprep.mubr.f32.mxu0 %v78_v20  ;;  %417 = vmatprep.mubr.f32.mxu1 %v86_v21 }
  0x61   :  { %406 = vmatmul.mubr.f32.gmra.mxu0 %v79_v22  ;;  %418 = vmatmul.mubr.f32.gmra.mxu1 %v87_v23 }
  0x62   :  { %408 = vmatprep.mubr.f32.mxu0 %v80_v24  ;;  %420 = vmatprep.mubr.f32.mxu1 %v88_v25 }
  0x65   :  { %409 = vmatmul.mubr.f32.gmra.mxu0 %v81_v26  ;;  %421 = vmatmul.mubr.f32.gmra.mxu1 %v89_v27 }
  0x66   :  { %411 = vmatprep.mubr.f32.mxu0 %v82_v28  ;;  %423 = vmatprep.mubr.f32.mxu1 %v90_v29 }
  0x69   :  { %412 = vmatmul.mubr.f32.gmra.mxu0 %v83_v30  ;;  %424 = vmatmul.mubr.f32.gmra.mxu1 %v91_v31 }
 0x11d   :  { %v404_v32 = vpop.f32.mrf.mxu0  ;;  %v416_v33 = vpop.f32.mrf.mxu1 }
 0x11e   :  { %305 = vst [vmem:[#allocation8 + $0x8] sm:$0xff] %v404_v32  ;;  %313 = vst [vmem:[#allocation8 + $0x48] sm:$0xff] %v416_v33 }
 0x11f   :  { %v174_v34 = vpop.f32.mrf.mxu0  ;;  %v214_v35 = vpop.f32.mrf.mxu1 }
 0x120   :  { %304 = vst [vmem:[#allocation8] sm:$0xff] %v174_v34  ;;  %312 = vst [vmem:[#allocation8 + $0x40] sm:$0xff] %v214_v35 }
 0x121   :  { %v407_v36 = vpop.f32.mrf.mxu0  ;;  %v419_v37 = vpop.f32.mrf.mxu1 }
 0x122   :  { %307 = vst [vmem:[#allocation8 + $0x18] sm:$0xff] %v407_v36  ;;  %315 = vst [vmem:[#allocation8 + $0x58] sm:$0xff] %v419_v37 }
 0x123   :  { %v184_v38 = vpop.f32.mrf.mxu0  ;;  %v224_v39 = vpop.f32.mrf.mxu1 }
 0x124   :  { %306 = vst [vmem:[#allocation8 + $0x10] sm:$0xff] %v184_v38  ;;  %314 = vst [vmem:[#allocation8 + $0x50] sm:$0xff] %v224_v39 }
 0x125   :  { %v410_v40 = vpop.f32.mrf.mxu0  ;;  %v422_v41 = vpop.f32.mrf.mxu1 }
 0x126   :  { %309 = vst [vmem:[#allocation8 + $0x28] sm:$0xff] %v410_v40  ;;  %317 = vst [vmem:[#allocation8 + $0x68] sm:$0xff] %v422_v41 }
 0x127   :  { %v194_v42 = vpop.f32.mrf.mxu0  ;;  %v234_v43 = vpop.f32.mrf.mxu1 }
 0x128   :  { %308 = vst [vmem:[#allocation8 + $0x20] sm:$0xff] %v194_v42  ;;  %316 = vst [vmem:[#allocation8 + $0x60] sm:$0xff] %v234_v43 }
 0x129   :  { %v413_v44 = vpop.f32.mrf.mxu0  ;;  %v425_v45 = vpop.f32.mrf.mxu1 }
 0x12a   :  { %311 = vst [vmem:[#allocation8 + $0x38] sm:$0xff] %v413_v44  ;;  %319 = vst [vmem:[#allocation8 + $0x78] sm:$0xff] %v425_v45 }
 0x12b   :  { %v204_v46 = vpop.f32.mrf.mxu0  ;;  %v244_v47 = vpop.f32.mrf.mxu1 }
 0x12c   :  { %310 = vst [vmem:[#allocation8 + $0x30] sm:$0xff] %v204_v46  ;;  %318 = vst [vmem:[#allocation8 + $0x70] sm:$0xff] %v244_v47 }
 0x12d   :  { %514 = shalt.err (!%p511_p0)
}
 0x12e   :  { %331 = dma.vmem_to_hbm [thread:$0]  %s326_s1, 2048, %s569_s2, [#allocation5], %s530_s12, %s530_s12, %s531_s13  }
 0x12f   :  { %527 = dma.done.wait [#allocation5], 2048  }
 0x130   :  { %528 = vsyncadd [#allocation5], 4294965248 }
 0x131   :  { %335 = vsyncpa [#allocation4], 1 }
 0x132   :  { %336 = vsyncpa [#allocation7], 1 }
 0x133   :  { %337 = vsyncpa [#allocation5], 1 }

</bundles_post_ra>
